<compile_context>
chip_gen: v7x
topology: tpu7x:2x2x1
jax: 0.10.0
libtpu: 0.0.40
codegen_flags: <defaults>
</compile_context>

<pallas_src>
import functools
import math

import jax
import jax.numpy as jnp
from jax import lax
from jax.experimental import pallas as pl
from jax.experimental.pallas import tpu as pltpu


# ------------------------------ helpers ------------------------------
def _round_up(n, m):
    return ((n + m - 1) // m) * m


def _round_down(n, m):
    return max(m, (n // m) * m)


def _pad2d(a, rows, cols):
    r, c = a.shape
    if r == rows and c == cols:
        return a
    return jnp.pad(a, ((0, rows - r), (0, cols - c)))


def _sublane(dtype):
    return {4: 8, 2: 16, 1: 32}.get(jnp.dtype(dtype).itemsize, 8)


def _vmem_capacity_bytes():
    try:
        return int(pltpu.get_tpu_info().vmem_capacity_bytes)
    except Exception:
        return 64 * 1024 * 1024  # v7x per-TensorCore — the strictest budget


def _select_tiles(In, Out, w_itemsize, tile_out, tile_k, n_weight_ops=2):
    """Pick (tile_out, tile_k, padded_out, padded_in) under a VMEM budget."""
    out128 = _round_up(Out, 128)
    in128 = _round_up(In, 128)
    to_ = min(tile_out, out128)
    tk = min(tile_k, in128)
    # Guarantee >= 2 Out tiles when the layer allows it: the "parallel" Out
    # axis is what shards across v7x's two TensorCores (free on v5e/v6e).
    if out128 >= 256:
        to_ = min(to_, _round_down(out128 // 2, 128))
    # Keep double-buffered weight tiles inside a safe slice of VMEM.
    weight_budget = int(0.4 * _vmem_capacity_bytes())

    def wbytes(t_o, t_k):
        return n_weight_ops * 2 * t_o * t_k * w_itemsize

    while wbytes(to_, tk) > weight_budget and tk > 128:
        tk = _round_down(tk // 2, 128)
    while wbytes(to_, tk) > weight_budget and to_ > 128:
        to_ = _round_down(to_ // 2, 128)

    out_p = _round_up(out128, to_)
    in_p = _round_up(in128, tk)
    return to_, tk, out_p, in_p


def _vmem_limit_bytes(b_p, to_, tk, in_p, x_full, n_weight_ops, w_itemsize, x_itemsize):
    w = n_weight_ops * 2 * to_ * tk * w_itemsize            # double-buffered weights
    xb = 2 * b_p * (in_p if x_full else tk) * x_itemsize    # activations
    ob = 2 * b_p * to_ * 4                                  # output block
    acc = b_p * to_ * 4                                     # accumulator scratch
    rows = 2 * 8 * (in_p + 4 * to_) * 4                     # eps / bias rows (sublane padded)
    total = w + xb + ob + acc + rows
    cap = _vmem_capacity_bytes()
    return int(min(max(int(total * 1.3) + (2 << 20), 16 << 20), int(cap * 0.9)))


# --------------------------- Pallas kernels ---------------------------
def _noisy_train_multi_k_kernel(x_ref, ein_ref, eout_ref, wmu_ref, wsig_ref,
                                bmu_ref, bsig_ref, beps_ref, o_ref, acc_ref,
                                *, tk, x_resident):
    k = pl.program_id(1)

    @pl.when(k == 0)
    def _():
        acc_ref[...] = jnp.zeros_like(acc_ref)

    if x_resident:
        off = pl.multiple_of(k * tk, 128)
        x = x_ref[:, pl.ds(off, tk)]
        ein = ein_ref[:, pl.ds(off, tk)]
    else:
        x = x_ref[...]
        ein = ein_ref[...]

    wdt = wmu_ref.dtype
    # x @ wmu.T  +  eps_out_row * ((x * eps_in_row) @ wsig.T), both transpose-free.
    mu_part = lax.dot_general(x.astype(wdt), wmu_ref[...],
                              dimension_numbers=(((1,), (1,)), ((), ())),
                              preferred_element_type=jnp.float32)
    nz_part = lax.dot_general((x * ein).astype(wdt), wsig_ref[...],
                              dimension_numbers=(((1,), (1,)), ((), ())),
                              preferred_element_type=jnp.float32)
    acc_ref[...] += mu_part + eout_ref[...] * nz_part

    @pl.when(k == pl.num_programs(1) - 1)
    def _():
        bias = bmu_ref[...] + bsig_ref[...] * beps_ref[...]
        o_ref[...] = (acc_ref[...] + bias).astype(o_ref.dtype)


def _noisy_train_single_k_kernel(x_ref, ein_ref, eout_ref, wmu_ref, wsig_ref,
                                 bmu_ref, bsig_ref, beps_ref, o_ref):
    wdt = wmu_ref.dtype
    x = x_ref[...]
    mu_part = lax.dot_general(x.astype(wdt), wmu_ref[...],
                              dimension_numbers=(((1,), (1,)), ((), ())),
                              preferred_element_type=jnp.float32)
    nz_part = lax.dot_general((x * ein_ref[...]).astype(wdt), wsig_ref[...],
                              dimension_numbers=(((1,), (1,)), ((), ())),
                              preferred_element_type=jnp.float32)
    bias = bmu_ref[...] + bsig_ref[...] * beps_ref[...]
    o_ref[...] = (mu_part + eout_ref[...] * nz_part + bias).astype(o_ref.dtype)


def _mu_multi_k_kernel(x_ref, wmu_ref, bmu_ref, o_ref, acc_ref, *, tk, x_resident):
    k = pl.program_id(1)

    @pl.when(k == 0)
    def _():
        acc_ref[...] = jnp.zeros_like(acc_ref)

    if x_resident:
        off = pl.multiple_of(k * tk, 128)
        x = x_ref[:, pl.ds(off, tk)]
    else:
        x = x_ref[...]

    acc_ref[...] += lax.dot_general(x.astype(wmu_ref.dtype), wmu_ref[...],
                                    dimension_numbers=(((1,), (1,)), ((), ())),
                                    preferred_element_type=jnp.float32)

    @pl.when(k == pl.num_programs(1) - 1)
    def _():
        o_ref[...] = (acc_ref[...] + bmu_ref[...]).astype(o_ref.dtype)


def _mu_single_k_kernel(x_ref, wmu_ref, bmu_ref, o_ref):
    out = lax.dot_general(x_ref[...].astype(wmu_ref.dtype), wmu_ref[...],
                          dimension_numbers=(((1,), (1,)), ((), ())),
                          preferred_element_type=jnp.float32)
    o_ref[...] = (out + bmu_ref[...]).astype(o_ref.dtype)


# --------------------------- prepare / forward ---------------------------
def prepare_noisy_linear(weight_mu, weight_sigma, bias_mu, bias_sigma, *,
                         tile_out=512, tile_k=1024, weight_dtype=None):
    """One-time (per-parameter-update) padding of the static parameters.

    Hoists the weight pads out of the per-forward hot path; optionally casts
    the streamed weights to bf16 (weight_dtype=jnp.bfloat16) to halve HBM
    traffic on this bandwidth-bound kernel.
    """
    Out, In = weight_mu.shape
    w_dt = jnp.dtype(weight_dtype) if weight_dtype is not None else jnp.dtype(weight_mu.dtype)
    to_, tk, out_p, in_p = _select_tiles(In, Out, w_dt.itemsize, tile_out, tile_k)
    return dict(
        wmu=_pad2d(weight_mu, out_p, in_p).astype(w_dt),
        wsig=_pad2d(weight_sigma, out_p, in_p).astype(w_dt),
        bmu=_pad2d(bias_mu.reshape(1, Out), 1, out_p).astype(jnp.float32),
        bsig=_pad2d(bias_sigma.reshape(1, Out), 1, out_p).astype(jnp.float32),
        cfg=dict(Out=Out, In=In, to_=to_, tk=tk, out_p=out_p, in_p=in_p),
    )


def noisy_linear_forward(x, prepared, eps_in, eps_out, bias_epsilon, *, training=True):
    """NoisyLinear.forward (weight_epsilon == outer(eps_out, eps_in) assumed)."""
    cfg = prepared["cfg"]
    Out, In = cfg["Out"], cfg["In"]
    to_, tk, out_p, in_p = cfg["to_"], cfg["tk"], cfg["out_p"], cfg["in_p"]

    B, In_x = x.shape
    assert In_x == In, "x feature dim must match the prepared layer"

    x_itemsize = jnp.dtype(x.dtype).itemsize
    b_p = _round_up(B, _sublane(x.dtype))
    x_p = _pad2d(x, b_p, in_p)

    n_out = out_p // to_
    n_k = in_p // tk
    # Keep activations resident across the whole grid when small (DQN sizes).
    x_resident = (n_k > 1) and (b_p * in_p * x_itemsize <= (8 << 20))

    n_weight_ops = 2 if training else 1
    w_itemsize = jnp.dtype(prepared["wmu"].dtype).itemsize
    vmem_limit = _vmem_limit_bytes(b_p, to_, tk, in_p, x_resident or n_k == 1,
                                   n_weight_ops, w_itemsize, x_itemsize)
    out_shape = jax.ShapeDtypeStruct((b_p, out_p), x.dtype)

    if n_k == 1:
        grid = (n_out,)
        x_spec = pl.BlockSpec((b_p, in_p), lambda i: (0, 0))
        ein_spec = pl.BlockSpec((1, in_p), lambda i: (0, 0))
        w_spec = pl.BlockSpec((to_, in_p), lambda i: (i, 0))
        row_spec = pl.BlockSpec((1, to_), lambda i: (0, i))
        o_spec = pl.BlockSpec((b_p, to_), lambda i: (0, i))
        dims = ("parallel",)
        scratch = []
        train_kernel = _noisy_train_single_k_kernel
        mu_kernel = _mu_single_k_kernel
    else:
        grid = (n_out, n_k)
        if x_resident:
            x_spec = pl.BlockSpec((b_p, in_p), lambda i, k: (0, 0))
            ein_spec = pl.BlockSpec((1, in_p), lambda i, k: (0, 0))
        else:
            x_spec = pl.BlockSpec((b_p, tk), lambda i, k: (0, k))
            ein_spec = pl.BlockSpec((1, tk), lambda i, k: (0, k))
        w_spec = pl.BlockSpec((to_, tk), lambda i, k: (i, k))
        row_spec = pl.BlockSpec((1, to_), lambda i, k: (0, i))
        o_spec = pl.BlockSpec((b_p, to_), lambda i, k: (0, i))
        dims = ("parallel", "arbitrary")
        scratch = [pltpu.VMEM((b_p, to_), jnp.float32)]
        train_kernel = functools.partial(_noisy_train_multi_k_kernel,
                                         tk=tk, x_resident=x_resident)
        mu_kernel = functools.partial(_mu_multi_k_kernel,
                                      tk=tk, x_resident=x_resident)

    cparams = pltpu.CompilerParams(dimension_semantics=dims,
                                   vmem_limit_bytes=vmem_limit)

    if training:
        ein_p = _pad2d(eps_in.reshape(1, In).astype(x.dtype), 1, in_p)
        eout_p = _pad2d(eps_out.reshape(1, Out).astype(jnp.float32), 1, out_p)
        beps_p = _pad2d(bias_epsilon.reshape(1, Out).astype(jnp.float32), 1, out_p)
        res = pl.pallas_call(
            train_kernel,
            out_shape=out_shape,
            grid=grid,
            in_specs=[x_spec, ein_spec, row_spec, w_spec, w_spec,
                      row_spec, row_spec, row_spec],
            out_specs=o_spec,
            scratch_shapes=scratch,
            compiler_params=cparams,
        )(x_p, ein_p, eout_p, prepared["wmu"], prepared["wsig"],
          prepared["bmu"], prepared["bsig"], beps_p)
    else:
        res = pl.pallas_call(
            mu_kernel,
            out_shape=out_shape,
            grid=grid,
            in_specs=[x_spec, w_spec, row_spec],
            out_specs=o_spec,
            scratch_shapes=scratch,
            compiler_params=cparams,
        )(x_p, prepared["wmu"], prepared["bmu"])

    return res[:B, :Out]


# -------------------- deterministic parameter construction --------------------
def _scale_noise(key, size):
    n = jax.random.normal(key, (size,), dtype=jnp.float32)
    return jnp.sign(n) * jnp.sqrt(jnp.abs(n))


def init_noisy_linear(key, input_dim, output_dim, std_init=0.5):
    k_wmu, k_bmu, k_ein, k_eout, k_beps = jax.random.split(key, 5)
    mu_range = 1.0 / math.sqrt(input_dim)
    return dict(
        weight_mu=jax.random.uniform(k_wmu, (output_dim, input_dim),
                                     jnp.float32, -mu_range, mu_range),
        bias_mu=jax.random.uniform(k_bmu, (output_dim,),
                                   jnp.float32, -mu_range, mu_range),
        weight_sigma=jnp.full((output_dim, input_dim),
                              std_init / math.sqrt(input_dim), jnp.float32),
        bias_sigma=jnp.full((output_dim,),
                            std_init / math.sqrt(output_dim), jnp.float32),
        eps_in=_scale_noise(k_ein, input_dim),
        eps_out=_scale_noise(k_eout, output_dim),
        bias_epsilon=_scale_noise(k_beps, output_dim),
    )


def _reference(x, p, training):
    weight_epsilon = jnp.outer(p["eps_out"], p["eps_in"])   # .ger()
    if training:
        w = p["weight_mu"] + p["weight_sigma"] * weight_epsilon
        b = p["bias_mu"] + p["bias_sigma"] * p["bias_epsilon"]
    else:
        w = p["weight_mu"]
        b = p["bias_mu"]
    return x @ w.T + b


# ----------------------------------- main -----------------------------------
if __name__ == "__main__":
    jax.config.update("jax_default_matmul_precision", "highest")
    key = jax.random.PRNGKey(0)

    # --- case 1: typical small DQN layer (single-K, single-Out-tile path) ---
    k_param, k_x, k2_param, k2_x = jax.random.split(key, 4)
    batch, input_dim, output_dim = 8, 32, 16
    params = init_noisy_linear(k_param, input_dim, output_dim, std_init=0.5)
    x = jax.random.normal(k_x, (batch, input_dim), dtype=jnp.float32)

    prepared = prepare_noisy_linear(params["weight_mu"], params["weight_sigma"],
                                    params["bias_mu"], params["bias_sigma"])

    out_train = jax.block_until_ready(noisy_linear_forward(
        x, prepared, params["eps_in"], params["eps_out"], params["bias_epsilon"],
        training=True))
    out_eval = jax.block_until_ready(noisy_linear_forward(
        x, prepared, params["eps_in"], params["eps_out"], params["bias_epsilon"],
        training=False))

    assert out_train.shape == (batch, output_dim)
    assert jnp.allclose(out_train, _reference(x, params, True), atol=1e-5, rtol=1e-5)
    assert jnp.allclose(out_eval, _reference(x, params, False), atol=1e-5, rtol=1e-5)

    # --- case 2: force the tiled multi-K / multi-Out path (x kept resident) ---
    batch2, input_dim2, output_dim2 = 16, 256, 256
    params2 = init_noisy_linear(k2_param, input_dim2, output_dim2, std_init=0.5)
    x2 = jax.random.normal(k2_x, (batch2, input_dim2), dtype=jnp.float32)

    prepared2 = prepare_noisy_linear(params2["weight_mu"], params2["weight_sigma"],
                                     params2["bias_mu"], params2["bias_sigma"],
                                     tile_out=128, tile_k=128)   # grid = (2, 2)

    out2_train = jax.block_until_ready(noisy_linear_forward(
        x2, prepared2, params2["eps_in"], params2["eps_out"], params2["bias_epsilon"],
        training=True))
    out2_eval = jax.block_until_ready(noisy_linear_forward(
        x2, prepared2, params2["eps_in"], params2["eps_out"], params2["bias_epsilon"],
        training=False))

    assert out2_train.shape == (batch2, output_dim2)
    assert jnp.allclose(out2_train, _reference(x2, params2, True), atol=1e-4, rtol=1e-4)
    assert jnp.allclose(out2_eval, _reference(x2, params2, False), atol=1e-4, rtol=1e-4)

    print("KERNEL_OK")
</pallas_src>

<mosaic_0001>
module attributes {stable_mosaic.version = 11 : i64} {
  func.func @_noisy_train_single_k_kernel(%arg0: i32, %arg1: memref<8x128xf32, #tpu.memory_space<vmem>>, %arg2: memref<1x128xf32, #tpu.memory_space<vmem>>, %arg3: memref<1x128xf32, #tpu.memory_space<vmem>>, %arg4: memref<128x128xf32, #tpu.memory_space<vmem>>, %arg5: memref<128x128xf32, #tpu.memory_space<vmem>>, %arg6: memref<1x128xf32, #tpu.memory_space<vmem>>, %arg7: memref<1x128xf32, #tpu.memory_space<vmem>>, %arg8: memref<1x128xf32, #tpu.memory_space<vmem>>, %arg9: memref<8x128xf32, #tpu.memory_space<vmem>>) attributes {dimension_semantics = [#tpu.dimension_semantics<parallel>], iteration_bounds = array<i64: 1>, scalar_prefetch = 0 : i64, scratch_operands = 0 : i64, tpu.core_type = #tpu.core_type<tc>, window_params = [{pipeline_mode = #tpu.pipeline_mode<synchronous>, transform_indices = @transform_0, window_bounds = array<i64: 8, 128>}, {pipeline_mode = #tpu.pipeline_mode<synchronous>, transform_indices = @transform_1, window_bounds = array<i64: 1, 128>}, {transform_indices = @transform_2, window_bounds = array<i64: 1, 128>}, {transform_indices = @transform_3, window_bounds = array<i64: 128, 128>}, {transform_indices = @transform_4, window_bounds = array<i64: 128, 128>}, {transform_indices = @transform_5, window_bounds = array<i64: 1, 128>}, {transform_indices = @transform_6, window_bounds = array<i64: 1, 128>}, {transform_indices = @transform_7, window_bounds = array<i64: 1, 128>}, {transform_indices = @transform_8, window_bounds = array<i64: 8, 128>}]} {
    %c0 = arith.constant 0 : index
    %c0_0 = arith.constant 0 : index
    %0 = vector.load %arg1[%c0, %c0_0] : memref<8x128xf32, #tpu.memory_space<vmem>>, vector<8x128xf32>
    %c0_1 = arith.constant 0 : index
    %c0_2 = arith.constant 0 : index
    %1 = vector.load %arg4[%c0_1, %c0_2] : memref<128x128xf32, #tpu.memory_space<vmem>>, vector<128x128xf32>
    %cst = arith.constant dense<0.000000e+00> : vector<8x128xf32>
    %2 = tpu.matmul %0, %1, %cst {dimension_numbers = #tpu.dot_dimension_numbers<[1], [1], [0], [0], [0, 0, 1, 0], [], []>, precision = #tpu.contract_precision<fp32>} : vector<8x128xf32>, vector<128x128xf32>, vector<8x128xf32> -> vector<8x128xf32>
    %c0_3 = arith.constant 0 : index
    %c0_4 = arith.constant 0 : index
    %3 = vector.load %arg2[%c0_3, %c0_4] : memref<1x128xf32, #tpu.memory_space<vmem>>, vector<1x128xf32>
    %4 = vector.broadcast %3 : vector<1x128xf32> to vector<8x128xf32>
    %5 = arith.mulf %0, %4 : vector<8x128xf32>
    %c0_5 = arith.constant 0 : index
    %c0_6 = arith.constant 0 : index
    %6 = vector.load %arg5[%c0_5, %c0_6] : memref<128x128xf32, #tpu.memory_space<vmem>>, vector<128x128xf32>
    %cst_7 = arith.constant dense<0.000000e+00> : vector<8x128xf32>
    %7 = tpu.matmul %5, %6, %cst_7 {dimension_numbers = #tpu.dot_dimension_numbers<[1], [1], [0], [0], [0, 0, 1, 0], [], []>, precision = #tpu.contract_precision<fp32>} : vector<8x128xf32>, vector<128x128xf32>, vector<8x128xf32> -> vector<8x128xf32>
    %c0_8 = arith.constant 0 : index
    %c0_9 = arith.constant 0 : index
    %8 = vector.load %arg6[%c0_8, %c0_9] : memref<1x128xf32, #tpu.memory_space<vmem>>, vector<1x128xf32>
    %c0_10 = arith.constant 0 : index
    %c0_11 = arith.constant 0 : index
    %9 = vector.load %arg7[%c0_10, %c0_11] : memref<1x128xf32, #tpu.memory_space<vmem>>, vector<1x128xf32>
    %c0_12 = arith.constant 0 : index
    %c0_13 = arith.constant 0 : index
    %10 = vector.load %arg8[%c0_12, %c0_13] : memref<1x128xf32, #tpu.memory_space<vmem>>, vector<1x128xf32>
    %11 = arith.mulf %9, %10 : vector<1x128xf32>
    %12 = arith.addf %8, %11 : vector<1x128xf32>
    %c0_14 = arith.constant 0 : index
    %c0_15 = arith.constant 0 : index
    %13 = vector.load %arg3[%c0_14, %c0_15] : memref<1x128xf32, #tpu.memory_space<vmem>>, vector<1x128xf32>
    %14 = vector.broadcast %13 : vector<1x128xf32> to vector<8x128xf32>
    %15 = arith.mulf %14, %7 : vector<8x128xf32>
    %16 = arith.addf %2, %15 : vector<8x128xf32>
    %17 = vector.broadcast %12 : vector<1x128xf32> to vector<8x128xf32>
    %18 = arith.addf %16, %17 : vector<8x128xf32>
    %c0_16 = arith.constant 0 : index
    %c0_17 = arith.constant 0 : index
    %19 = vector.load %arg9[%c0_16, %c0_17] : memref<8x128xf32, #tpu.memory_space<vmem>>, vector<8x128xf32>
    tpu.vector_store %arg9[%c0_16, %c0_17], %18 {strides = array<i32>} : memref<8x128xf32, #tpu.memory_space<vmem>>, vector<8x128xf32>,
    return
  }
  func.func @transform_0(%arg0: i32) -> (i32, i32) {
    %c0_i32 = arith.constant 0 : i32
    %c0_i32_0 = arith.constant 0 : i32
    %c0_i32_1 = arith.constant 0 : i32
    return %c0_i32, %c0_i32_0 : i32, i32
  }
  func.func @transform_1(%arg0: i32) -> (i32, i32) {
    %c0_i32 = arith.constant 0 : i32
    %c0_i32_0 = arith.constant 0 : i32
    %c0_i32_1 = arith.constant 0 : i32
    return %c0_i32, %c0_i32_0 : i32, i32
  }
  func.func @transform_2(%arg0: i32) -> (i32, i32) {
    %c0_i32 = arith.constant 0 : i32
    %c0_i32_0 = arith.constant 0 : i32
    return %c0_i32, %arg0 : i32, i32
  }
  func.func @transform_3(%arg0: i32) -> (i32, i32) {
    %c0_i32 = arith.constant 0 : i32
    %c0_i32_0 = arith.constant 0 : i32
    return %arg0, %c0_i32 : i32, i32
  }
  func.func @transform_4(%arg0: i32) -> (i32, i32) {
    %c0_i32 = arith.constant 0 : i32
    %c0_i32_0 = arith.constant 0 : i32
    return %arg0, %c0_i32 : i32, i32
  }
  func.func @transform_5(%arg0: i32) -> (i32, i32) {
    %c0_i32 = arith.constant 0 : i32
    %c0_i32_0 = arith.constant 0 : i32
    return %c0_i32, %arg0 : i32, i32
  }
  func.func @transform_6(%arg0: i32) -> (i32, i32) {
    %c0_i32 = arith.constant 0 : i32
    %c0_i32_0 = arith.constant 0 : i32
    return %c0_i32, %arg0 : i32, i32
  }
  func.func @transform_7(%arg0: i32) -> (i32, i32) {
    %c0_i32 = arith.constant 0 : i32
    %c0_i32_0 = arith.constant 0 : i32
    return %c0_i32, %arg0 : i32, i32
  }
  func.func @transform_8(%arg0: i32) -> (i32, i32) {
    %c0_i32 = arith.constant 0 : i32
    %c0_i32_0 = arith.constant 0 : i32
    return %c0_i32, %arg0 : i32, i32
  }
}

</mosaic_0001>

<bundles_post_ra>
// kernel: tpu_custom_call.1
= control target key start
LH: loop header
LB: loop body
LE: loop exit
PB: predicated region body
PF: predicated region fallthrough
CT: control target
= control target key end

     0   :  { %13 = vsyncpa [#allocation3], 0  ;;  %s3268_s0 = inlined_call_operand.hbm [shape: f32[8,128], index: 0, kind: input, shape index: {}]   ;;  %s3269_s1 = inlined_call_operand.vmem [shape: f32[1,128], index: 1, kind: input, shape index: {}]   ;;  %s3270_s2 = inlined_call_operand.vmem [shape: f32[1,128], index: 2, kind: input, shape index: {}]   ;;  %s3271_s3 = inlined_call_operand.hbm [shape: f32[128,128], index: 3, kind: input, shape index: {}]   ;;  %s3272_s4 = inlined_call_operand.hbm [shape: f32[128,128], index: 4, kind: input, shape index: {}]   ;;  %s3273_s5 = inlined_call_operand.vmem [shape: f32[1,128], index: 5, kind: input, shape index: {}]   ;;  %s3274_s6 = inlined_call_operand.vmem [shape: f32[1,128], index: 6, kind: input, shape index: {}]   ;;  %s3275_s7 = inlined_call_operand.vmem [shape: f32[1,128], index: 7, kind: input, shape index: {}]   ;;  %s3276_s8 = inlined_call_operand.hbm [shape: f32[8,128], index: 8, kind: output, shape index: {}]  }
   0x1   :  { %14 = vsyncpa [#allocation6], 0 }
   0x2   :  { %15 = vsyncpa [#allocation4], 0  ;;  %s2456_s27 = smov [#allocation5]   ;;  %s2362_s9 = scalar_lea.hbm %s3271_s3, 2048 }
   0x3   :  { %s35_s28 = sshll.u32 %s2456_s27, 4  ;;  %p2363_p0 = scmp.ne.s32.totalorder %s3271_s3, %s2362_s9  ;;  %s36_s28 = int_to_ptr.vmem [resolvable:$true] %s35_s28 }
   0x4   :  { %p2366_p1 = scmp.lt.u32.totalorder %s2362_s9, %s3271_s3 }
   0x6   :  { %p2368_p2 = pnand %p2366_p1, %p2363_p0 }
   0x8   :  { %2371 = shalt.err (!%p2368_p2)
}
   0x9   :  { %s2372_s14 = scalar_lea.vmem %s36_s28, 2048  ;;  %p2377_p4 = scmp.lt.s32.totalorder %s36_s28, %s36_s28 }
   0xa   :  { %p2373_p3 = scmp.ne.s32.totalorder %s36_s28, %s2372_s14  ;;  %p2378_p5 = scmp.lt.s32.totalorder %s2372_s14, %s2372_s14 }
   0xc   :  { %p2379_p6 = por %p2378_p5, %p2377_p4 }
   0xe   :  { %p2380_p7 = pnand %p2379_p6, %p2373_p3 }
  0x10   :  { %2383 = shalt.err (!%p2380_p7)
}
  0x11   :  { %s2457_s15 = smov 128   ;;  %s2458_s16 = smov 8  }
  0x12   :  { %41 = dma.hbm_to_vmem [thread:$0]  %s3271_s3, 2048, %s36_s28, [#allocation6], %s2457_s15, %s2457_s15, %s2458_s16  }
  0x13   :  { %s2459_s19 = smov [#allocation2]   ;;  %s2460_s21 = smov [#allocation7]  }
  0x14   :  { %s22_s20 = sshll.u32 %s2459_s19, 4  ;;  %s47_s22 = sshll.u32 %s2460_s21, 4  ;;  %s23_s20 = int_to_ptr.vmem [resolvable:$true] %s22_s20  ;;  %s48_s22 = int_to_ptr.vmem [resolvable:$true] %s47_s22 }
  0x15   :  { %s2384_s25 = scalar_lea.hbm %s3268_s0, 128 }
  0x16   :  { %p2385_p8 = scmp.ne.s32.totalorder %s3268_s0, %s2384_s25  ;;  %p2388_p9 = scmp.lt.u32.totalorder %s2384_s25, %s3268_s0 }
  0x18   :  { %p2390_p10 = pnand %p2388_p9, %p2385_p8 }
  0x1a   :  { %2393 = shalt.err (!%p2390_p10)
}
  0x1b   :  { %s2394_s3 = scalar_lea.vmem %s23_s20, 128  ;;  %p2399_p12 = scmp.lt.s32.totalorder %s23_s20, %s23_s20 }
  0x1c   :  { %p2395_p11 = scmp.ne.s32.totalorder %s23_s20, %s2394_s3  ;;  %p2400_p13 = scmp.lt.s32.totalorder %s2394_s3, %s2394_s3 }
  0x1e   :  { %p2401_p0 = por %p2400_p13, %p2399_p12 }
  0x20   :  { %p2402_p1 = pnand %p2401_p0, %p2395_p11 }
  0x22   :  { %2405 = shalt.err (!%p2402_p1)
}
  0x23   :  { %25 = dma.hbm_to_vmem [thread:$0]  %s3268_s0, 128, %s23_s20, [#allocation3]  }
  0x24   :  { %s2406_s12 = scalar_lea.hbm %s3272_s4, 2048 }
  0x25   :  { %p2407_p2 = scmp.ne.s32.totalorder %s3272_s4, %s2406_s12  ;;  %p2410_p3 = scmp.lt.u32.totalorder %s2406_s12, %s3272_s4 }
  0x27   :  { %p2412_p4 = pnand %p2410_p3, %p2407_p2 }
  0x29   :  { %2415 = shalt.err (!%p2412_p4)
}
  0x2a   :  { %s2416_s19 = scalar_lea.vmem %s48_s22, 2048  ;;  %p2421_p6 = scmp.lt.s32.totalorder %s48_s22, %s48_s22 }
  0x2b   :  { %p2417_p5 = scmp.ne.s32.totalorder %s48_s22, %s2416_s19  ;;  %p2422_p7 = scmp.lt.s32.totalorder %s2416_s19, %s2416_s19 }
  0x2d   :  { %p2423_p8 = por %p2422_p7, %p2421_p6 }
  0x2f   :  { %p2424_p9 = pnand %p2423_p8, %p2417_p5 }
  0x31   :  { %2427 = shalt.err (!%p2424_p9)
}
  0x32   :  { %53 = dma.hbm_to_vmem [thread:$0]  %s3272_s4, 2048, %s48_s22, [#allocation6], %s2457_s15, %s2457_s15, %s2458_s16  }
  0x33   :  { %2450 = dma.done.wait [#allocation3], 128  }
  0x34   :  { %2451 = vsyncadd [#allocation3], 4294967168 }
  0x35   :  { %2452 = dma.done.wait [#allocation6], 4096  }
  0x36   :  { %2453 = vsyncadd [#allocation6], 4294963200  ;;  %v3281_v0 = vmov 0.0|0.0   ;;  %vm2462_vm0 = vmmov 0   ;;  %v3277_v1 = vmov 0.0   ;;  %v2558_v2 = vld [vmem:[#allocation7] sm:$0xff] }
  0x37   :  { %2055 = vmatprep.subr.bf16.mxu0 %v3281_v0  ;;  %2199 = vmatprep.subr.bf16.mxu1 %v3281_v0  ;;  %v2560_v3 = vld [vmem:[#allocation7 + $0x8] sm:$0xff]  ;;  %v111_v4 = vand.u32 4294901760, %v2558_v2  ;;  %v2564_v6 = vld [vmem:[#allocation5] sm:$0xff]  ;;  %v2568_v8 = vld [vmem:[#allocation7 + $0x10] sm:$0xff] }
  0x38   :  { %1667 = vmatprep.mubr.msk.f32.mxu0 %vm2462_vm0, %v3277_v1  ;;  %1877 = vmatprep.mubr.msk.f32.mxu1 %vm2462_vm0, %v3277_v1  ;;  %v114_v5 = vand.u32 4294901760, %v2560_v3  ;;  %v2566_v7 = vld [vmem:[#allocation5 + $0x8] sm:$0xff]  ;;  %v2570_v9 = vld [vmem:[#allocation7 + $0x18] sm:$0xff]  ;;  %v765_v10 = vand.u32 4294901760, %v2564_v6  ;;  %v2580_v13 = vld [vmem:[#allocation5 + $0x10] sm:$0xff]  ;;  %v117_v16 = vand.u32 4294901760, %v2568_v8 }
  0x39   :  { %v768_v11 = vand.u32 4294901760, %v2566_v7  ;;  %v2582_v14 = vld [vmem:[#allocation5 + $0x18] sm:$0xff]  ;;  %v120_v17 = vand.u32 4294901760, %v2570_v9  ;;  %v771_v18 = vand.u32 4294901760, %v2580_v13  ;;  %v98_v21 = vld [vmem:[#allocation7 + $0x20] sm:$0xff]  ;;  %v2604_v22 = vld [vmem:[#allocation7 + $0x28] sm:$0xff]  ;;  %v2666_v60 = vsub.f32 %v2558_v2, %v111_v4 }
  0x3a   :  { %v2578_v12 = vpack.c.bf16 %v114_v5, %v111_v4  ;;  %v774_v19 = vand.u32 4294901760, %v2582_v14  ;;  %v2612_v24 = vld [vmem:[#allocation5 + $0x20] sm:$0xff]  ;;  %v2614_v25 = vld [vmem:[#allocation5 + $0x28] sm:$0xff]  ;;  %v123_v26 = vand.u32 4294901760, %v98_v21  ;;  %v126_v27 = vand.u32 4294901760, %v2604_v22  ;;  %v100_v31 = vld [vmem:[#allocation7 + $0x30] sm:$0xff] }
  0x3b   :  { %v2588_v15 = vpack.c.bf16 %v768_v11, %v765_v10  ;;  %v2602_v20 = vpack.c.bf16 %v120_v17, %v117_v16  ;;  %v777_v28 = vand.u32 4294901760, %v2612_v24  ;;  %v780_v29 = vand.u32 4294901760, %v2614_v25  ;;  %v101_v32 = vld [vmem:[#allocation7 + $0x38] sm:$0xff]  ;;  %v2631_v34 = vld [vmem:[#allocation5 + $0x30] sm:$0xff]  ;;  %v102_v41 = vld [vmem:[#allocation7 + $0x40] sm:$0xff] }
  0x3c   :  { %2057 = vmatpush3.bf16.xpose.msra.mxu0 %v2578_v12  ;;  %v2610_v23 = vpack.c.bf16 %v774_v19, %v771_v18  ;;  %v2623_v30 = vpack.c.bf16 %v126_v27, %v123_v26  ;;  %v2633_v35 = vld [vmem:[#allocation5 + $0x38] sm:$0xff]  ;;  %v129_v36 = vand.u32 4294901760, %v100_v31  ;;  %v132_v37 = vand.u32 4294901760, %v101_v32  ;;  %v103_v42 = vld [vmem:[#allocation7 + $0x48] sm:$0xff]  ;;  %v2645_v44 = vld [vmem:[#allocation5 + $0x40] sm:$0xff] }
  0x3d   :  { %2058 = vmatprep.subr.bf16.mxu0 %v3281_v0  ;;  %2201 = vmatpush3.bf16.xpose.msra.mxu1 %v2588_v15  ;;  %v2629_v33 = vpack.c.bf16 %v780_v29, %v777_v28  ;;  %v783_v38 = vand.u32 4294901760, %v2631_v34  ;;  %v786_v39 = vand.u32 4294901760, %v2633_v35  ;;  %v2647_v45 = vld [vmem:[#allocation5 + $0x48] sm:$0xff]  ;;  %v135_v46 = vand.u32 4294901760, %v102_v41  ;;  %v104_v51 = vld [vmem:[#allocation7 + $0x50] sm:$0xff]  ;;  %v105_v52 = vld [vmem:[#allocation7 + $0x58] sm:$0xff] }
  0x3e   :  { %2202 = vmatprep.subr.bf16.mxu1 %v3281_v0  ;;  %v2641_v40 = vpack.c.bf16 %v132_v37, %v129_v36  ;;  %v138_v47 = vand.u32 4294901760, %v103_v42  ;;  %v789_v48 = vand.u32 4294901760, %v2645_v44  ;;  %v792_v49 = vand.u32 4294901760, %v2647_v45  ;;  %v80_v54 = vld [vmem:[#allocation5 + $0x50] sm:$0xff]  ;;  %v81_v55 = vld [vmem:[#allocation5 + $0x58] sm:$0xff]  ;;  %v106_v1 = vld [vmem:[#allocation7 + $0x60] sm:$0xff] }
  0x3f   :  { %v2643_v43 = vpack.c.bf16 %v786_v39, %v783_v38  ;;  %v141_v56 = vand.u32 4294901760, %v104_v51  ;;  %v144_v57 = vand.u32 4294901760, %v105_v52  ;;  %v795_v58 = vand.u32 4294901760, %v80_v54 }
  0x40   :  { %v2655_v50 = vpack.c.bf16 %v138_v47, %v135_v46  ;;  %v2657_v53 = vpack.c.bf16 %v792_v49, %v789_v48  ;;  %v798_v59 = vand.u32 4294901760, %v81_v55  ;;  %v2671_v61 = vsub.f32 %v2560_v3, %v114_v5 }
  0x41   :  { %3323 = vst [vmem:[#allocation12_spill] sm:$0xff] %v2643_v43  ;;  %v2676_v62 = vsub.f32 %v2568_v8, %v117_v16  ;;  %v2681_v63 = vsub.f32 %v2570_v9, %v120_v17  ;;  %v2686_v2 = vsub.f32 %v2564_v6, %v765_v10  ;;  %v2691_v3 = vsub.f32 %v2566_v7, %v768_v11  ;;  %v107_v8 = vld [vmem:[#allocation7 + $0x68] sm:$0xff]  ;;  %v69_v16 = vld [vmem:[#allocation2] sm:$0xff] }
  0x42   :  { %3324 = vst [vmem:[#allocation13_spill] sm:$0xff] %v2655_v50  ;;  %3325 = vst [vmem:[#allocation14_spill] sm:$0xff] %v2657_v53  ;;  %v2693_v4 = vsub.f32 %v98_v21, %v123_v26  ;;  %v2695_v5 = vpack.c.bf16 %v144_v57, %v141_v56  ;;  %v1429_v9 = vld [vmem:[%s3269_s1] ss:$0 sm:$0xff]  ;;  %v2701_v17 = vsub.f32 %v2604_v22, %v126_v27  ;;  %v147_v27 = vand.u32 4294901760, %v106_v1 }
  0x43   :  { %v2706_v6 = vsub.f32 %v2580_v13, %v771_v18  ;;  %v2711_v7 = vsub.f32 %v2582_v14, %v774_v19  ;;  %v2713_v10 = vpack.c.bf16 %v798_v59, %v795_v58  ;;  %v2715_v11 = vsub.f32 %v100_v31, %v129_v36  ;;  %v2729_v18 = vld [vmem:[#allocation7 + $0x70] sm:$0xff]  ;;  %v2731_v14 = vld [vmem:[#allocation5 + $0x60] sm:$0xff]  ;;  %v2733_v19 = vld [vmem:[#allocation5 + $0x68] sm:$0xff] }
  0x44   :  { %2060 = vmatpush3.bf16.xpose.msra.mxu0 %v2602_v20  ;;  %3326 = vst [vmem:[#allocation15_spill] sm:$0xff] %v2695_v5  ;;  %v2717_v21 = vsub.f32 %v101_v32, %v132_v37  ;;  %v2722_v22 = vsub.f32 %v2612_v24, %v777_v28  ;;  %v2727_v13 = vsub.f32 %v2614_v25, %v780_v29  ;;  %v150_v31 = vand.u32 4294901760, %v107_v8  ;;  %v109_v32 = vld [vmem:[#allocation7 + $0x78] sm:$0xff] }
  0x45   :  { %2061 = vmatprep.subr.bf16.mxu0 %v3281_v0  ;;  %2204 = vmatpush3.bf16.xpose.msra.mxu1 %v2610_v23  ;;  %3327 = vst [vmem:[#allocation16_spill] sm:$0xff] %v2713_v10  ;;  %v2735_v26 = vsub.f32 %v102_v41, %v135_v46  ;;  %v93_v36 = vmul.f32 %v1429_v9, %v69_v16  ;;  %v153_v41 = vand.u32 4294901760, %v2729_v18  ;;  %v2783_v9 = vand.u32 4294901760, %v69_v16 }
  0x46   :  { %2205 = vmatprep.subr.bf16.mxu1 %v3281_v0  ;;  %v2737_v37 = vsub.f32 %v103_v42, %v138_v47  ;;  %v2740_v24 = vsub.f32 %v2631_v34, %v783_v38  ;;  %v2743_v25 = vsub.f32 %v2633_v35, %v786_v39  ;;  %v2746_v28 = vsub.f32 %v104_v51, %v141_v56 }
  0x47   :  { %v2748_v29 = vsub.f32 %v105_v52, %v144_v57  ;;  %v801_v42 = vand.u32 4294901760, %v2731_v14  ;;  %v804_v34 = vand.u32 4294901760, %v2733_v19  ;;  %v2756_v38 = vsub.f32 %v2645_v44, %v789_v48  ;;  %v2772_v57 = vld [vmem:[#allocation5 + $0x70] sm:$0xff]  ;;  %v2774_v44 = vld [vmem:[#allocation5 + $0x78] sm:$0xff] }
  0x48   :  { %v2759_v35 = vsub.f32 %v2647_v45, %v792_v49  ;;  %v156_v39 = vand.u32 4294901760, %v109_v32  ;;  %v2764_v47 = vpack.c.bf16 %v150_v31, %v147_v27  ;;  %v2766_v51 = vsub.f32 %v106_v1, %v147_v27 }
  0x49   :  { %v2768_v52 = vsub.f32 %v107_v8, %v150_v31  ;;  %v2770_v56 = vand.u32 4294901760, %v93_v36  ;;  %v2776_v45 = vsub.f32 %v80_v54, %v795_v58  ;;  %v2778_v48 = vsub.f32 %v81_v55, %v798_v59 }
  0x4a   :  { %3328 = vst [vmem:[#allocation17_spill] sm:$0xff] %v2764_v47  ;;  %v2781_v49 = vsub.f32 %v2729_v18, %v153_v41  ;;  %v2785_v46 = vsub.f32 %v109_v32, %v156_v39  ;;  %v2787_v1 = vpack.c.bf16 %v804_v34, %v801_v42  ;;  %v807_v54 = vand.u32 4294901760, %v2772_v57 }
  0x4b   :  { %v810_v55 = vand.u32 4294901760, %v2774_v44  ;;  %v2798_v59 = vsub.f32 %v93_v36, %v2770_v56  ;;  %v2808_v31 = vsub.f32 %v69_v16, %v2783_v9  ;;  %v2832_v27 = vpack.c.bf16 %v156_v39, %v153_v41 }
  0x4c   :  { %2063 = vmatpush3.bf16.xpose.msra.mxu0 %v2623_v30  ;;  %3329 = vst [vmem:[#allocation18_spill] sm:$0xff] %v2787_v1  ;;  %v3331_v16 = vand.u32 4294901760, %v2666_v60  ;;  %v3332_v32 = vand.u32 4294901760, %v2671_v61  ;;  %v3334_v36 = vand.u32 4294901760, %v2686_v2  ;;  %v3335_v8 = vand.u32 4294901760, %v2691_v3 }
  0x4d   :  { %2064 = vmatprep.subr.bf16.mxu0 %v3281_v0  ;;  %2207 = vmatpush3.bf16.xpose.msra.mxu1 %v2629_v33  ;;  %3330 = vst [vmem:[#allocation19_spill] sm:$0xff] %v2832_v27  ;;  %v2850_v39 = vsub.f32 %v2731_v14, %v801_v42  ;;  %v3338_v42 = vmov 0.0|0.0  }
  0x4e   :  { %2208 = vmatprep.subr.bf16.mxu1 %v3281_v0  ;;  %v859_v18 = vsub.f32 %v2686_v2, %v3334_v36  ;;  %v866_v41 = vsub.f32 %v2691_v3, %v3335_v8  ;;  %v3337_v8 = vand.u32 4294901760, %v2808_v31 }
  0x50   :  { %v848_v14 = vsub.f32 %v2808_v31, %v3337_v8 }
  0x54   :  { %2066 = vmatpush3.bf16.xpose.msra.mxu0 %v2641_v40 }
  0x55   :  { %2067 = vmatprep.subr.bf16.mxu0 %v3281_v0  ;;  %2210 = vmatpush3.bf16.xpose.msra.mxu1 %v2643_v43  ;;  %v849_v43 = vand.u32 4294901760, %v848_v14  ;;  %v3301_v14 = vand.u32 4294901760, %v2693_v4 }
  0x56   :  { %2211 = vmatprep.subr.bf16.mxu1 %v3281_v0 }
  0x5c   :  { %2069 = vmatpush3.bf16.xpose.msra.mxu0 %v2655_v50 }
  0x5d   :  { %2070 = vmatprep.subr.bf16.mxu0 %v3281_v0  ;;  %2213 = vmatpush3.bf16.xpose.msra.mxu1 %v2657_v53 }
  0x5e   :  { %2214 = vmatprep.subr.bf16.mxu1 %v3281_v0 }
  0x64   :  { %2072 = vmatpush3.bf16.xpose.msra.mxu0 %v2695_v5  ;;  %v879_v5 = vand.u32 4294901760, %v2711_v7 }
  0x65   :  { %2073 = vmatprep.subr.bf16.mxu0 %v3281_v0  ;;  %2216 = vmatpush3.bf16.xpose.msra.mxu1 %v2713_v10  ;;  %v872_v10 = vand.u32 4294901760, %v2706_v6 }
  0x66   :  { %2217 = vmatprep.subr.bf16.mxu1 %v3281_v0 }
  0x6c   :  { %2075 = vmatpush3.bf16.xpose.msra.mxu0 %v2764_v47  ;;  %v2841_v47 = vpack.c.bf16 %v810_v55, %v807_v54 }
  0x6d   :  { %2076 = vmatprep.subr.bf16.mxu0 %v3281_v0  ;;  %2219 = vmatpush3.bf16.xpose.msra.mxu1 %v2787_v1  ;;  %v205_v1 = vsub.f32 %v2666_v60, %v3331_v16  ;;  %v2853_v16 = vsub.f32 %v2733_v19, %v804_v34  ;;  %v860_v34 = vand.u32 4294901760, %v859_v18  ;;  %v3340_v19 = vand.u32 4294901760, %v2681_v63 }
  0x6e   :  { %2220 = vmatprep.subr.bf16.mxu1 %v3281_v0  ;;  %v212_v0 = vsub.f32 %v2671_v61, %v3332_v32  ;;  %3333 = vst [vmem:[#allocation20_spill] sm:$0xff] %v2841_v47  ;;  %v3336_v32 = vand.u32 4294901760, %v2798_v59  ;;  %v873_v18 = vsub.f32 %v2706_v6, %v872_v10 }
  0x6f   :  { %v206_v36 = vand.u32 4294901760, %v205_v1  ;;  %v3339_v1 = vand.u32 4294901760, %v2676_v62  ;;  %v226_v50 = vsub.f32 %v2681_v63, %v3340_v19  ;;  %v3299_v19 = vand.u32 4294901760, %v2701_v17 }
  0x70   :  { %v194_v58 = vsub.f32 %v2798_v59, %v3336_v32  ;;  %v213_v53 = vand.u32 4294901760, %v212_v0  ;;  %v867_v32 = vand.u32 4294901760, %v866_v41  ;;  %v880_v41 = vsub.f32 %v2711_v7, %v879_v5 }
  0x71   :  { %v219_v8 = vsub.f32 %v2676_v62, %v3339_v1  ;;  %v2887_v1 = vsub.f32 %v2774_v44, %v810_v55  ;;  %v3300_v44 = vand.u32 4294901760, %v2722_v22  ;;  %v3305_v55 = vand.u32 4294901760, %v2727_v13 }
  0x72   :  { %v195_v0 = vand.u32 4294901760, %v194_v58  ;;  %v2884_v58 = vsub.f32 %v2772_v57, %v807_v54  ;;  %v874_v57 = vand.u32 4294901760, %v873_v18  ;;  %v881_v54 = vand.u32 4294901760, %v880_v41 }
  0x74   :  { %2078 = vmatpush3.bf16.xpose.msra.mxu0 %v2832_v27  ;;  %v2080_v27 = vpack.c.bf16 %v213_v53, %v206_v36  ;;  %v220_v53 = vand.u32 4294901760, %v219_v8  ;;  %v227_v36 = vand.u32 4294901760, %v226_v50  ;;  %v3341_v50 = vmov 0.0  }
  0x75   :  { %2079 = vmatprep.subr.bf16.mxu0 %v3338_v42  ;;  %2222 = vmatpush3.bf16.xpose.msra.mxu1 %v2841_v47  ;;  %v2224_v47 = vpack.c.bf16 %v867_v32, %v860_v34  ;;  %v2269_v34 = vpack.c.bf16 %v2887_v1, %v2884_v58  ;;  %v2227_v32 = vpack.c.bf16 %v881_v54, %v874_v57  ;;  %v3304_v54 = vand.u32 4294901760, %v2740_v24 }
  0x76   :  { %2223 = vmatprep.subr.bf16.mxu1 %v3338_v42  ;;  %v894_v8 = vsub.f32 %v2727_v13, %v3305_v55 }
  0x78   :  { %v895_v57 = vand.u32 4294901760, %v894_v8 }
  0x7b   :  { %1668 = vmatmul.mubr.f32.vlgmr.msra.gmra.mrb[0].mxu0 %v195_v0  ;;  %v887_v0 = vsub.f32 %v2722_v22, %v3300_v44  ;;  %v3309_v44 = vand.u32 4294901760, %v2743_v25 }
  0x7c   :  { %2081 = vmatpush3.bf16.xpose.msra.mxu0 %v2080_v27  ;;  %1878 = vmatmul.mubr.f32.vlgmr.msra.gmra.mrb[0].mxu1 %v849_v43  ;;  %v2083_v43 = vpack.c.bf16 %v227_v36, %v220_v53  ;;  %v233_v27 = vsub.f32 %v2693_v4, %v3301_v14  ;;  %v3302_v53 = vand.u32 4294901760, %v2715_v11  ;;  %v3303_v36 = vand.u32 4294901760, %v2717_v21 }
  0x7d   :  { %2082 = vmatprep.subr.bf16.mxu0 %v3338_v42  ;;  %2225 = vmatpush3.bf16.xpose.msra.mxu1 %v2224_v47  ;;  %v240_v47 = vsub.f32 %v2701_v17, %v3299_v19  ;;  %v888_v19 = vand.u32 4294901760, %v887_v0  ;;  %v908_v0 = vsub.f32 %v2743_v25, %v3309_v44 }
  0x7e   :  { %2226 = vmatprep.subr.bf16.mxu1 %v3338_v42  ;;  %1702 = vmatprep.mubr.msk.f32.mxu0 %vm2462_vm0, %v3341_v50  ;;  %v234_v18 = vand.u32 4294901760, %v233_v27  ;;  %v254_v27 = vsub.f32 %v2717_v21, %v3303_v36 }
  0x7f   :  { %1912 = vmatprep.mubr.msk.f32.mxu1 %vm2462_vm0, %v3341_v50  ;;  %v241_v41 = vand.u32 4294901760, %v240_v47  ;;  %v2230_v47 = vpack.c.bf16 %v895_v57, %v888_v19  ;;  %v909_v19 = vand.u32 4294901760, %v908_v0  ;;  %v3308_v57 = vand.u32 4294901760, %v2756_v38 }
  0x81   :  { %v2086_v14 = vpack.c.bf16 %v241_v41, %v234_v18  ;;  %v255_v18 = vand.u32 4294901760, %v254_v27  ;;  %v3306_v41 = vand.u32 4294901760, %v2735_v26 }
  0x84   :  { %2084 = vmatpush3.bf16.xpose.msra.mxu0 %v2083_v43  ;;  %v247_v43 = vsub.f32 %v2715_v11, %v3302_v53  ;;  %v3307_v53 = vand.u32 4294901760, %v2737_v37 }
  0x85   :  { %2085 = vmatprep.subr.bf16.mxu0 %v3338_v42  ;;  %2228 = vmatpush3.bf16.xpose.msra.mxu1 %v2227_v32  ;;  %v901_v32 = vsub.f32 %v2740_v24, %v3304_v54  ;;  %v3313_v54 = vand.u32 4294901760, %v2759_v35 }
  0x86   :  { %2229 = vmatprep.subr.bf16.mxu1 %v3338_v42  ;;  %v248_v8 = vand.u32 4294901760, %v247_v43  ;;  %v268_v43 = vsub.f32 %v2737_v37, %v3307_v53 }
  0x87   :  { %v902_v36 = vand.u32 4294901760, %v901_v32  ;;  %v922_v32 = vsub.f32 %v2759_v35, %v3313_v54 }
  0x88   :  { %v2089_v55 = vpack.c.bf16 %v255_v18, %v248_v8  ;;  %v269_v8 = vand.u32 4294901760, %v268_v43  ;;  %v3310_v18 = vand.u32 4294901760, %v2746_v28 }
  0x89   :  { %v2233_v27 = vpack.c.bf16 %v909_v19, %v902_v36  ;;  %v923_v36 = vand.u32 4294901760, %v922_v32  ;;  %v3312_v19 = vand.u32 4294901760, %v2776_v45 }
  0x8c   :  { %2087 = vmatpush3.bf16.xpose.msra.mxu0 %v2086_v14  ;;  %v261_v14 = vsub.f32 %v2735_v26, %v3306_v41  ;;  %v3311_v41 = vand.u32 4294901760, %v2748_v29 }
  0x8d   :  { %2088 = vmatprep.subr.bf16.mxu0 %v3338_v42  ;;  %2231 = vmatpush3.bf16.xpose.msra.mxu1 %v2230_v47  ;;  %v915_v47 = vsub.f32 %v2756_v38, %v3308_v57  ;;  %v3317_v57 = vand.u32 4294901760, %v2778_v48 }
  0x8e   :  { %2232 = vmatprep.subr.bf16.mxu1 %v3338_v42  ;;  %v262_v0 = vand.u32 4294901760, %v261_v14  ;;  %v282_v14 = vsub.f32 %v2748_v29, %v3311_v41 }
  0x8f   :  { %v916_v53 = vand.u32 4294901760, %v915_v47  ;;  %v936_v47 = vsub.f32 %v2778_v48, %v3317_v57 }
  0x90   :  { %v2092_v44 = vpack.c.bf16 %v269_v8, %v262_v0  ;;  %v283_v0 = vand.u32 4294901760, %v282_v14  ;;  %v3314_v8 = vand.u32 4294901760, %v2766_v51 }
  0x91   :  { %v2236_v43 = vpack.c.bf16 %v923_v36, %v916_v53  ;;  %v937_v53 = vand.u32 4294901760, %v936_v47  ;;  %v3316_v36 = vand.u32 4294901760, %v2850_v39 }
  0x94   :  { %2090 = vmatpush3.bf16.xpose.msra.mxu0 %v2089_v55  ;;  %v275_v55 = vsub.f32 %v2746_v28, %v3310_v18  ;;  %v3315_v18 = vand.u32 4294901760, %v2768_v52 }
  0x95   :  { %2091 = vmatprep.subr.bf16.mxu0 %v3338_v42  ;;  %2234 = vmatpush3.bf16.xpose.msra.mxu1 %v2233_v27  ;;  %v929_v27 = vsub.f32 %v2776_v45, %v3312_v19  ;;  %v3322_v19 = vand.u32 4294901760, %v2853_v16 }
  0x96   :  { %2235 = vmatprep.subr.bf16.mxu1 %v3338_v42  ;;  %v276_v32 = vand.u32 4294901760, %v275_v55  ;;  %v296_v55 = vsub.f32 %v2768_v52, %v3315_v18 }
  0x97   :  { %v930_v41 = vand.u32 4294901760, %v929_v27  ;;  %v950_v27 = vsub.f32 %v2853_v16, %v3322_v19  ;;  %v3371_v19 = vand.u32 4294901760, %v2808_v31 }
  0x98   :  { %v2095_v54 = vpack.c.bf16 %v283_v0, %v276_v32  ;;  %v297_v32 = vand.u32 4294901760, %v296_v55  ;;  %v3318_v0 = vand.u32 4294901760, %v2781_v49 }
  0x99   :  { %v2239_v14 = vpack.c.bf16 %v937_v53, %v930_v41  ;;  %v951_v41 = vand.u32 4294901760, %v950_v27  ;;  %v3321_v53 = vand.u32 4294901760, %v2884_v58 }
  0x9c   :  { %2093 = vmatpush3.bf16.xpose.msra.mxu0 %v2092_v44  ;;  %v289_v44 = vsub.f32 %v2766_v51, %v3314_v8  ;;  %v3319_v8 = vand.u32 4294901760, %v2785_v46 }
  0x9d   :  { %2094 = vmatprep.subr.bf16.mxu0 %v3338_v42  ;;  %2237 = vmatpush3.bf16.xpose.msra.mxu1 %v2236_v43  ;;  %v943_v43 = vsub.f32 %v2850_v39, %v3316_v36  ;;  %v3320_v36 = vand.u32 4294901760, %v2887_v1 }
  0x9e   :  { %2238 = vmatprep.subr.bf16.mxu1 %v3338_v42  ;;  %v290_v47 = vand.u32 4294901760, %v289_v44  ;;  %v310_v44 = vsub.f32 %v2785_v46, %v3319_v8 }
  0x9f   :  { %v944_v18 = vand.u32 4294901760, %v943_v43  ;;  %v964_v43 = vsub.f32 %v2887_v1, %v3320_v36 }
  0xa0   :  { %v2098_v57 = vpack.c.bf16 %v297_v32, %v290_v47  ;;  %v311_v47 = vand.u32 4294901760, %v310_v44  ;;  %v3347_v44 = vpack.c.bf16 %v2727_v13, %v2722_v22 }
  0xa1   :  { %v2242_v55 = vpack.c.bf16 %v951_v41, %v944_v18  ;;  %v3343_v41 = vpack.c.bf16 %v2691_v3, %v2686_v2 }
  0xa4   :  { %2096 = vmatpush3.bf16.xpose.msra.mxu0 %v2095_v54  ;;  %v303_v54 = vsub.f32 %v2781_v49, %v3318_v0  ;;  %v965_v0 = vand.u32 4294901760, %v964_v43  ;;  %v3350_v43 = vpack.c.bf16 %v2737_v37, %v2735_v26 }
  0xa5   :  { %2097 = vmatprep.subr.bf16.mxu0 %v3338_v42  ;;  %2240 = vmatpush3.bf16.xpose.msra.mxu1 %v2239_v14  ;;  %v957_v14 = vsub.f32 %v2884_v58, %v3321_v53  ;;  %v3370_v53 = vand.u32 4294901760, %v2798_v59 }
  0xa6   :  { %2241 = vmatprep.subr.bf16.mxu1 %v3338_v42  ;;  %v304_v27 = vand.u32 4294901760, %v303_v54  ;;  %v3346_v54 = vpack.c.bf16 %v2701_v17, %v2693_v4 }
  0xa7   :  { %v958_v32 = vand.u32 4294901760, %v957_v14  ;;  %v3349_v14 = vpack.c.bf16 %v2743_v25, %v2740_v24 }
  0xa8   :  { %v2101_v8 = vpack.c.bf16 %v311_v47, %v304_v27  ;;  %v3351_v27 = vpack.c.bf16 %v2759_v35, %v2756_v38  ;;  %v3352_v47 = vpack.c.bf16 %v2748_v29, %v2746_v28 }
  0xa9   :  { %v2245_v18 = vpack.c.bf16 %v965_v0, %v958_v32  ;;  %v3345_v0 = vpack.c.bf16 %v2711_v7, %v2706_v6  ;;  %v3353_v32 = vpack.c.bf16 %v2778_v48, %v2776_v45  ;;  %v3378_v6 = vand.u32 4294901760, %v2715_v11 }
  0xac   :  { %2099 = vmatpush3.bf16.xpose.msra.mxu0 %v2098_v57  ;;  %v3342_v57 = vpack.c.bf16 %v2671_v61, %v2666_v60 }
  0xad   :  { %2100 = vmatprep.subr.bf16.mxu0 %v3338_v42  ;;  %2243 = vmatpush3.bf16.xpose.msra.mxu1 %v2242_v55  ;;  %v3348_v55 = vpack.c.bf16 %v2717_v21, %v2715_v11 }
  0xae   :  { %2244 = vmatprep.subr.bf16.mxu1 %v3338_v42 }
  0xb4   :  { %2102 = vmatpush3.bf16.xpose.msra.mxu0 %v2101_v8  ;;  %v3344_v8 = vpack.c.bf16 %v2681_v63, %v2676_v62 }
  0xb5   :  { %2103 = vmatprep.subr.bf16.mxu0 %v3338_v42  ;;  %2246 = vmatpush3.bf16.xpose.msra.mxu1 %v2245_v18  ;;  %v3354_v18 = vpack.c.bf16 %v2768_v52, %v2766_v51 }
  0xb6   :  { %2247 = vmatprep.subr.bf16.mxu1 %v3338_v42 }
  0xbb   :  { %1703 = vmatmul.mubr.f32.vlgmr.msra.gmra.mrb[0].mxu0 %v2770_v56 }
  0xbc   :  { %2105 = vmatpush3.bf16.xpose.msra.mxu0 %v3342_v57  ;;  %1913 = vmatmul.mubr.f32.vlgmr.msra.gmra.mrb[2].mxu1 %v2783_v9  ;;  %v3355_v57 = vpack.c.bf16 %v2853_v16, %v2850_v39 }
  0xbd   :  { %2106 = vmatprep.subr.bf16.mxu0 %v3338_v42  ;;  %2249 = vmatpush3.bf16.xpose.msra.mxu1 %v3343_v41  ;;  %v3356_v41 = vpack.c.bf16 %v2785_v46, %v2781_v49 }
  0xbe   :  { %2250 = vmatprep.subr.bf16.mxu1 %v3338_v42  ;;  %1737 = vmatprep.mubr.msk.f32.mxu0 %vm2462_vm0, %v3341_v50 }
  0xbf   :  { %1947 = vmatprep.mubr.msk.f32.mxu1 %vm2462_vm0, %v3341_v50 }
  0xc4   :  { %2108 = vmatpush3.bf16.xpose.msra.mxu0 %v3344_v8  ;;  %v3358_v8 = vld [vmem:[#allocation13_spill] sm:$0xff] }
  0xc5   :  { %2109 = vmatprep.subr.bf16.mxu0 %v3338_v42  ;;  %2252 = vmatpush3.bf16.xpose.msra.mxu1 %v3345_v0  ;;  %v3359_v0 = vld [vmem:[#allocation14_spill] sm:$0xff] }
  0xc6   :  { %2253 = vmatprep.subr.bf16.mxu1 %v3338_v42 }
  0xcc   :  { %2111 = vmatpush3.bf16.xpose.msra.mxu0 %v3346_v54  ;;  %v3360_v54 = vld [vmem:[#allocation15_spill] sm:$0xff] }
  0xcd   :  { %2112 = vmatprep.subr.bf16.mxu0 %v3338_v42  ;;  %2255 = vmatpush3.bf16.xpose.msra.mxu1 %v3347_v44  ;;  %v3361_v44 = vld [vmem:[#allocation16_spill] sm:$0xff] }
  0xce   :  { %2256 = vmatprep.subr.bf16.mxu1 %v3338_v42 }
  0xd4   :  { %2114 = vmatpush3.bf16.xpose.msra.mxu0 %v3348_v55  ;;  %v3362_v55 = vld [vmem:[#allocation17_spill] sm:$0xff] }
  0xd5   :  { %2115 = vmatprep.subr.bf16.mxu0 %v3338_v42  ;;  %2258 = vmatpush3.bf16.xpose.msra.mxu1 %v3349_v14  ;;  %v3363_v14 = vld [vmem:[#allocation18_spill] sm:$0xff] }
  0xd6   :  { %2259 = vmatprep.subr.bf16.mxu1 %v3338_v42 }
  0xdc   :  { %2117 = vmatpush3.bf16.xpose.msra.mxu0 %v3350_v43  ;;  %v3364_v43 = vld [vmem:[#allocation19_spill] sm:$0xff] }
  0xdd   :  { %2118 = vmatprep.subr.bf16.mxu0 %v3338_v42  ;;  %2261 = vmatpush3.bf16.xpose.msra.mxu1 %v3351_v27  ;;  %v3365_v27 = vld [vmem:[#allocation20_spill] sm:$0xff] }
  0xde   :  { %2262 = vmatprep.subr.bf16.mxu1 %v3338_v42 }
  0xe4   :  { %2120 = vmatpush3.bf16.xpose.msra.mxu0 %v3352_v47  ;;  %v3366_v47 = vand.u32 4294901760, %v2666_v60  ;;  %v3372_v60 = vand.u32 4294901760, %v2676_v62  ;;  %v3376_v62 = vand.u32 4294901760, %v2722_v22  ;;  %v3381_v22 = vand.u32 4294901760, %v2743_v25 }
  0xe5   :  { %2121 = vmatprep.subr.bf16.mxu0 %v3338_v42  ;;  %2264 = vmatpush3.bf16.xpose.msra.mxu1 %v3353_v32  ;;  %v3367_v32 = vand.u32 4294901760, %v2671_v61  ;;  %v3373_v61 = vand.u32 4294901760, %v2681_v63  ;;  %v3377_v63 = vand.u32 4294901760, %v2727_v13  ;;  %v3387_v25 = vand.u32 4294901760, %v2748_v29 }
  0xe6   :  { %2265 = vmatprep.subr.bf16.mxu1 %v3338_v42  ;;  %v3393_v29 = vand.u32 4294901760, %v2853_v16 }
  0xec   :  { %2123 = vmatpush3.bf16.xpose.msra.mxu0 %v3354_v18  ;;  %v2152_v18 = vpack.c.bf16 %v3367_v32, %v3366_v47  ;;  %v3383_v47 = vand.u32 4294901760, %v2737_v37  ;;  %v3385_v32 = vand.u32 4294901760, %v2759_v35  ;;  %v3389_v37 = vand.u32 4294901760, %v2778_v48 }
  0xed   :  { %2124 = vmatprep.subr.bf16.mxu0 %v3338_v42  ;;  %2267 = vmatpush3.bf16.xpose.msra.mxu1 %v3355_v57  ;;  %v3368_v57 = vand.u32 4294901760, %v2686_v2  ;;  %v2155_v2 = vpack.c.bf16 %v3373_v61, %v3372_v60  ;;  %v3391_v35 = vand.u32 4294901760, %v2768_v52  ;;  %v3395_v48 = vand.u32 4294901760, %v2785_v46 }
  0xee   :  { %2268 = vmatprep.subr.bf16.mxu1 %v3338_v42  ;;  %v3397_v52 = vand.u32 4294901760, %v2887_v1 }
  0xf4   :  { %2126 = vmatpush3.bf16.xpose.msra.mxu0 %v3356_v41  ;;  %v3369_v41 = vand.u32 4294901760, %v2691_v3  ;;  %v2299_v3 = vpack.c.bf16 %v879_v5, %v872_v10  ;;  %v3380_v10 = vand.u32 4294901760, %v2740_v24  ;;  %v3386_v24 = vand.u32 4294901760, %v2746_v28 }
  0xf5   :  { %2127 = vmatprep.subr.bf16.mxu0 %v3338_v42  ;;  %2270 = vmatpush3.bf16.xpose.msra.mxu1 %v2269_v34  ;;  %v3357_v34 = vld [vmem:[#allocation12_spill] sm:$0xff]  ;;  %v3392_v28 = vand.u32 4294901760, %v2850_v39  ;;  %v1406_v39 = vlaneseq }
  0xf6   :  { %2271 = vmatprep.subr.bf16.mxu1 %v3338_v42  ;;  %v2296_v36 = vpack.c.bf16 %v3369_v41, %v3368_v57  ;;  %v2305_v13 = vpack.c.bf16 %v3381_v22, %v3380_v10  ;;  %v2167_v57 = vpack.c.bf16 %v3387_v25, %v3386_v24 }
  0xf7   :  { %v2314_v61 = vpack.c.bf16 %v3393_v29, %v3392_v28 }
  0xfb   :  { %1738 = vmatmul.mubr.f32.vlgmr.msra.gmra.mrb[0].mxu0 %v2798_v59  ;;  %v3375_v59 = vand.u32 4294901760, %v2701_v17 }
  0xfc   :  { %2129 = vmatpush3.bf16.xpose.msra.mxu0 %v2578_v12  ;;  %1948 = vmatmul.mubr.f32.vlgmr.msra.gmra.mrb[4].mxu1 %v2808_v31  ;;  %v3374_v31 = vand.u32 4294901760, %v2693_v4  ;;  %v3379_v4 = vand.u32 4294901760, %v2717_v21  ;;  %v3384_v21 = vand.u32 4294901760, %v2756_v38  ;;  %v3390_v38 = vand.u32 4294901760, %v2766_v51 }
  0xfd   :  { %2130 = vmatprep.subr.bf16.mxu0 %v3338_v42  ;;  %2273 = vmatpush3.bf16.xpose.msra.mxu1 %v2588_v15  ;;  %v3396_v51 = vand.u32 4294901760, %v2884_v58 }
  0xfe   :  { %2274 = vmatprep.subr.bf16.mxu1 %v3338_v42  ;;  %1772 = vmatprep.mubr.msk.f32.mxu0 %vm2462_vm0, %v3341_v50  ;;  %v2161_v7 = vpack.c.bf16 %v3379_v4, %v3378_v6  ;;  %v2170_v60 = vpack.c.bf16 %v3391_v35, %v3390_v38 }
  0xff   :  { %1982 = vmatprep.mubr.msk.f32.mxu1 %vm2462_vm0, %v3341_v50 }
 0x104   :  { %2132 = vmatpush3.bf16.xpose.msra.mxu0 %v2602_v20 }
 0x105   :  { %2133 = vmatprep.subr.bf16.mxu0 %v3338_v42  ;;  %2276 = vmatpush3.bf16.xpose.msra.mxu1 %v2610_v23 }
 0x106   :  { %2277 = vmatprep.subr.bf16.mxu1 %v3338_v42 }
 0x10c   :  { %2135 = vmatpush3.bf16.xpose.msra.mxu0 %v2623_v30 }
 0x10d   :  { %2136 = vmatprep.subr.bf16.mxu0 %v3338_v42  ;;  %2279 = vmatpush3.bf16.xpose.msra.mxu1 %v2629_v33 }
 0x10e   :  { %2280 = vmatprep.subr.bf16.mxu1 %v3338_v42 }
 0x114   :  { %2138 = vmatpush3.bf16.xpose.msra.mxu0 %v2641_v40 }
 0x115   :  { %2139 = vmatprep.subr.bf16.mxu0 %v3338_v42  ;;  %2282 = vmatpush3.bf16.xpose.msra.mxu1 %v3357_v34 }
 0x116   :  { %2283 = vmatprep.subr.bf16.mxu1 %v3338_v42 }
 0x11c   :  { %2141 = vmatpush3.bf16.xpose.msra.mxu0 %v3358_v8 }
 0x11d   :  { %2142 = vmatprep.subr.bf16.mxu0 %v3338_v42  ;;  %2285 = vmatpush3.bf16.xpose.msra.mxu1 %v3359_v0 }
 0x11e   :  { %2286 = vmatprep.subr.bf16.mxu1 %v3338_v42 }
 0x124   :  { %2144 = vmatpush3.bf16.xpose.msra.mxu0 %v3360_v54 }
 0x125   :  { %2145 = vmatprep.subr.bf16.mxu0 %v3338_v42  ;;  %2288 = vmatpush3.bf16.xpose.msra.mxu1 %v3361_v44 }
 0x126   :  { %2289 = vmatprep.subr.bf16.mxu1 %v3338_v42 }
 0x12c   :  { %2147 = vmatpush3.bf16.xpose.msra.mxu0 %v3362_v55 }
 0x12d   :  { %2148 = vmatprep.subr.bf16.mxu0 %v3338_v42  ;;  %2291 = vmatpush3.bf16.xpose.msra.mxu1 %v3363_v14 }
 0x12e   :  { %2292 = vmatprep.subr.bf16.mxu1 %v3338_v42 }
 0x134   :  { %2150 = vmatpush3.bf16.xpose.msra.mxu0 %v3364_v43 }
 0x135   :  { %2151 = vmatprep.subr.bf16.mxu0 %v3338_v42  ;;  %2294 = vmatpush3.bf16.xpose.msra.mxu1 %v3365_v27 }
 0x136   :  { %2295 = vmatprep.subr.bf16.mxu1 %v3338_v42 }
 0x13b   :  { %1773 = vmatmul.mubr.f32.vlgmr.msra.gmra.mrb[0].mxu0 %v3370_v53  ;;  %v3382_v53 = vand.u32 4294901760, %v2735_v26  ;;  %v3388_v26 = vand.u32 4294901760, %v2776_v45  ;;  %v3394_v45 = vand.u32 4294901760, %v2781_v49  ;;  %v1430_v49 = vld [vmem:[%s3270_s2] ss:$0 sm:$0xff] }
 0x13c   :  { %2153 = vmatpush3.bf16.xpose.msra.mxu0 %v2152_v18  ;;  %1983 = vmatmul.mubr.f32.vlgmr.msra.gmra.mrb[6].mxu1 %v3371_v19  ;;  %v2158_v19 = vpack.c.bf16 %v3375_v59, %v3374_v31  ;;  %v2308_v18 = vpack.c.bf16 %v3385_v32, %v3384_v21 }
 0x13d   :  { %2154 = vmatprep.subr.bf16.mxu0 %v3338_v42  ;;  %2297 = vmatpush3.bf16.xpose.msra.mxu1 %v2296_v36  ;;  %v2302_v36 = vpack.c.bf16 %v3377_v63, %v3376_v62  ;;  %v2164_v11 = vpack.c.bf16 %v3383_v47, %v3382_v53  ;;  %v2311_v41 = vpack.c.bf16 %v3389_v37, %v3388_v26 }
 0x13e   :  { %2298 = vmatprep.subr.bf16.mxu1 %v3338_v42  ;;  %1807 = vmatprep.mubr.msk.f32.mxu0 %vm2462_vm0, %v3341_v50 }
 0x13f   :  { %2017 = vmatprep.mubr.msk.f32.mxu1 %vm2462_vm0, %v3341_v50 }
 0x144   :  { %2156 = vmatpush3.bf16.xpose.msra.mxu0 %v2155_v2  ;;  %v2173_v2 = vpack.c.bf16 %v3395_v48, %v3394_v45 }
 0x145   :  { %2157 = vmatprep.subr.bf16.mxu0 %v3338_v42  ;;  %2300 = vmatpush3.bf16.xpose.msra.mxu1 %v2299_v3  ;;  %v2317_v3 = vpack.c.bf16 %v3397_v52, %v3396_v51 }
 0x146   :  { %2301 = vmatprep.subr.bf16.mxu1 %v3338_v42 }
 0x14c   :  { %2159 = vmatpush3.bf16.xpose.msra.mxu0 %v2158_v19 }
 0x14d   :  { %2160 = vmatprep.subr.bf16.mxu0 %v3338_v42  ;;  %2303 = vmatpush3.bf16.xpose.msra.mxu1 %v2302_v36 }
 0x14e   :  { %2304 = vmatprep.subr.bf16.mxu1 %v3338_v42 }
 0x14f   :  { %v3153_v5 = vpop.f32.mrb[0].mxu1 }
 0x150   :  { %v1879_v17 = vpop.f32.mrb[1].mxu1 }
 0x154   :  { %2162 = vmatpush3.bf16.xpose.msra.mxu0 %v2161_v7 }
 0x155   :  { %2163 = vmatprep.subr.bf16.mxu0 %v3338_v42  ;;  %2306 = vmatpush3.bf16.xpose.msra.mxu1 %v2305_v13 }
 0x156   :  { %2307 = vmatprep.subr.bf16.mxu1 %v3338_v42 }
 0x15c   :  { %2165 = vmatpush3.bf16.xpose.msra.mxu0 %v2164_v11 }
 0x15d   :  { %2166 = vmatprep.subr.bf16.mxu0 %v3338_v42  ;;  %2309 = vmatpush3.bf16.xpose.msra.mxu1 %v2308_v18 }
 0x15e   :  { %2310 = vmatprep.subr.bf16.mxu1 %v3338_v42 }
 0x164   :  { %2168 = vmatpush3.bf16.xpose.msra.mxu0 %v2167_v57 }
 0x165   :  { %2169 = vmatprep.subr.bf16.mxu0 %v3338_v42  ;;  %2312 = vmatpush3.bf16.xpose.msra.mxu1 %v2311_v41 }
 0x166   :  { %2313 = vmatprep.subr.bf16.mxu1 %v3338_v42 }
 0x16c   :  { %2171 = vmatpush3.bf16.xpose.msra.mxu0 %v2170_v60 }
 0x16d   :  { %2172 = vmatprep.subr.bf16.mxu0 %v3338_v42  ;;  %2315 = vmatpush3.bf16.xpose.msra.mxu1 %v2314_v61 }
 0x16e   :  { %2316 = vmatprep.subr.bf16.mxu1 %v3338_v42 }
 0x174   :  { %2174 = vmatpush3.bf16.xpose.msra.mxu0 %v2173_v2 }
 0x175   :  { %2175 = vmatprep.subr.bf16.mxu0 %v3338_v42  ;;  %2318 = vmatpush3.bf16.xpose.msra.mxu1 %v2317_v3 }
 0x176   :  { %2319 = vmatprep.subr.bf16.mxu1 %v3338_v42 }
 0x17b   :  { %1808 = vmatmul.mubr.f32.vlgmr.msra.gmra.mrb[0].mxu0 %v2770_v56 }
 0x17c   :  { %2177 = vmatpush3.bf16.xpose.msra.mxu0 %v2578_v12  ;;  %2018 = vmatmul.mubr.f32.vlgmr.msra.gmra.mrb[8].mxu1 %v2783_v9 }
 0x17d   :  { %2178 = vmatprep.subr.bf16.mxu0 %v3338_v42  ;;  %2321 = vmatpush3.bf16.xpose.msra.mxu1 %v2588_v15 }
 0x17e   :  { %2322 = vmatprep.subr.bf16.mxu1 %v3338_v42  ;;  %1842 = vmatprep.mubr.msk.f32.mxu0 %vm2462_vm0, %v3341_v50 }
 0x17f   :  { %2052 = vmatprep.mubr.msk.f32.mxu1 %vm2462_vm0, %v3341_v50 }
 0x184   :  { %2180 = vmatpush3.bf16.xpose.msra.mxu0 %v2602_v20 }
 0x185   :  { %2181 = vmatprep.subr.bf16.mxu0 %v3338_v42  ;;  %2324 = vmatpush3.bf16.xpose.msra.mxu1 %v2610_v23 }
 0x186   :  { %2325 = vmatprep.subr.bf16.mxu1 %v3338_v42 }
 0x18c   :  { %2183 = vmatpush3.bf16.xpose.msra.mxu0 %v2623_v30 }
 0x18d   :  { %2184 = vmatprep.subr.bf16.mxu0 %v3338_v42  ;;  %2327 = vmatpush3.bf16.xpose.msra.mxu1 %v2629_v33 }
 0x18e   :  { %2328 = vmatprep.subr.bf16.mxu1 %v3338_v42 }
 0x18f   :  { %v1002_v12 = vpop.f32.mrb[2].mxu1 }
 0x190   :  { %v1914_v15 = vpop.f32.mrb[3].mxu1 }
 0x194   :  { %2186 = vmatpush3.bf16.xpose.msra.mxu0 %v2641_v40 }
 0x195   :  { %2187 = vmatprep.subr.bf16.mxu0 %v3338_v42  ;;  %2330 = vmatpush3.bf16.xpose.msra.mxu1 %v3357_v34 }
 0x196   :  { %2331 = vmatprep.subr.bf16.mxu1 %v3338_v42 }
 0x19c   :  { %2189 = vmatpush3.bf16.xpose.msra.mxu0 %v3358_v8 }
 0x19d   :  { %2190 = vmatprep.subr.bf16.mxu0 %v3338_v42  ;;  %2333 = vmatpush3.bf16.xpose.msra.mxu1 %v3359_v0  ;;  %v1407_v0 = vshrl.u32 %v1406_v39, 7 }
 0x19e   :  { %2334 = vmatprep.subr.bf16.mxu1 %v3338_v42 }
 0x1a4   :  { %2192 = vmatpush3.bf16.xpose.msra.mxu0 %v3360_v54  ;;  %v751_v54 = vld [vmem:[%s3273_s5] sm:$0x1] }
 0x1a5   :  { %2193 = vmatprep.subr.bf16.mxu0 %v3338_v42  ;;  %2336 = vmatpush3.bf16.xpose.msra.mxu1 %v3361_v44 }
 0x1a6   :  { %2337 = vmatprep.subr.bf16.mxu1 %v3338_v42 }
 0x1ac   :  { %2195 = vmatpush3.bf16.xpose.msra.mxu0 %v3362_v55 }
 0x1ad   :  { %2196 = vmatprep.subr.bf16.mxu0 %v3338_v42  ;;  %2339 = vmatpush3.bf16.xpose.msra.mxu1 %v3363_v14 }
 0x1ae   :  { %2340 = vmatprep.subr.bf16.mxu1 %v3338_v42  ;;  %v752_v42 = vld [vmem:[%s3274_s6] sm:$0x1]  ;;  %s2464_s6 = smov [#allocation8]  }
 0x1b4   :  { %2198 = vmatpush3.bf16.xpose.msra.mxu0 %v3364_v43  ;;  %v1408_v43 = vsub.s32 0, %v1407_v0 }
 0x1b5   :  { %2342 = vmatpush3.bf16.xpose.msra.mxu1 %v3365_v27 }
 0x1bb   :  { %1843 = vmatmul.mubr.f32.vlgmr.msra.gmra.mrb[0].mxu0 %v2770_v56  ;;  %v753_v56 = vld [vmem:[%s3275_s7] sm:$0x1]  ;;  %s1419_s7 = sshll.u32 %s2464_s6, 4  ;;  %s1420_s7 = int_to_ptr.vmem [resolvable:$true] %s1419_s7 }
 0x1bc   :  { %2053 = vmatmul.mubr.f32.vlgmr.msra.gmra.mrb[10].mxu1 %v2783_v9  ;;  %v754_v8 = vmul.f32 %v753_v56, %v752_v42  ;;  %s2428_s26 = scalar_lea.vmem %s1420_s7, 128  ;;  %p2433_p11 = scmp.lt.s32.totalorder %s1420_s7, %s1420_s7 }
 0x1bd   :  { %p2429_p10 = scmp.ne.s32.totalorder %s1420_s7, %s2428_s26  ;;  %p2434_p12 = scmp.lt.s32.totalorder %s2428_s26, %s2428_s26 }
 0x1be   :  { %v755_v55 = vadd.f32 %v754_v8, %v751_v54 }
 0x1bf   :  { %p2435_p13 = por %p2434_p12, %p2433_p11 }
 0x1c0   :  { %v1409_v59 = vrot.slane %v755_v55, %v1408_v43 }
 0x1c1   :  { %p2436_p0 = pnand %p2435_p13, %p2429_p10 }
 0x1cf   :  { %v1106_v20 = vpop.f32.mrb[4].mxu1 }
 0x1d0   :  { %v1949_v23 = vpop.f32.mrb[5].mxu1 }
 0x20f   :  { %v1195_v30 = vpop.f32.mrb[6].mxu1 }
 0x210   :  { %v1984_v33 = vpop.f32.mrb[7].mxu1 }
 0x24f   :  { %v1314_v40 = vpop.f32.mrb[8].mxu1 }
 0x250   :  { %v2019_v46 = vpop.f32.mrb[9].mxu1 }
 0x28e   :  { %v747_v16 = vpop.f32.mrb[0].mxu0 }
 0x28f   :  { %v763_v9 = vmul.f32 %v1430_v49, %v747_v16  ;;  %v1844_v58 = vpop.f32.mrb[1].mxu0  ;;  %v1401_v1 = vpop.f32.mrb[10].mxu1 }
 0x290   :  { %v2054_v50 = vpop.f32.mrb[11].mxu1 }
 0x291   :  { %v852_v34 = vadd.f32 %v3153_v5, %v763_v9 }
 0x293   :  { %v1003_v44 = vadd.f32 %v1002_v12, %v852_v34 }
 0x295   :  { %v1107_v14 = vadd.f32 %v1106_v20, %v1003_v44 }
 0x297   :  { %v1196_v27 = vadd.f32 %v1195_v30, %v1107_v14 }
 0x299   :  { %v1315_v31 = vadd.f32 %v1314_v40, %v1196_v27 }
 0x29b   :  { %v1402_v19 = vadd.f32 %v1401_v1, %v1315_v31 }
 0x29d   :  { %v1411_v62 = vadd.f32 %v1409_v59, %v1402_v19 }
 0x29f   :  { %1412 = vst [vmem:[#allocation8] sm:$0xff] %v1411_v62 }
 0x2a0   :  { %2439 = shalt.err (!%p2436_p0)
}
 0x2a1   :  { %s2440_s29 = scalar_lea.hbm %s3276_s8, 128 }
 0x2a2   :  { %p2441_p1 = scmp.ne.s32.totalorder %s3276_s8, %s2440_s29  ;;  %p2444_p2 = scmp.lt.u32.totalorder %s2440_s29, %s3276_s8 }
 0x2a4   :  { %p2446_p3 = pnand %p2444_p2, %p2441_p1 }
 0x2a6   :  { %2449 = shalt.err (!%p2446_p3)
}
 0x2a7   :  { %1422 = dma.vmem_to_hbm [thread:$0]  %s1420_s7, 128, %s3276_s8, [#allocation4]  }
 0x2a8   :  { %2454 = dma.done.wait [#allocation4], 128  }
 0x2a9   :  { %2455 = vsyncadd [#allocation4], 4294967168 }
 0x2aa   :  { %1426 = vsyncpa [#allocation3], 1 }
 0x2ab   :  { %1427 = vsyncpa [#allocation6], 1 }
 0x2ac   :  { %1428 = vsyncpa [#allocation4], 1 }

</bundles_post_ra>
